<compile_context>
chip_gen: v7x
topology: tpu7x:2x2x1
jax: 0.10.0
libtpu: 0.0.40
codegen_flags: <defaults>
</compile_context>

<pallas_src>
import jax
import jax.numpy as jnp
from jax import lax
from jax.experimental import pallas as pl
from jax.experimental.pallas import tpu as pltpu


# Contract dim 1 of LHS with dim 1 of RHS, i.e. a @ b^T without a wrapper-side
# transpose (the MXU handles the transposed operand natively).
_DN_RHS_T = (((1,), (1,)), ((), ()))


def rnn_fc_kernel(x_ref, wih_ref, whh_ref, bih_ref, bhh_ref, wfc_ref, bfc_ref,
                  out_ref):
    """Fused kernel: full RNN recurrence + final linear layer (one TC, no grid).

    x_ref   : (T, B)  time-major input (input_size=1 squeezed)       (VMEM)
    wih_ref : (1, H)  input-to-hidden weights (W_ih with I=1, reshaped)
    whh_ref : (H, H)  hidden-to-hidden weights W_hh (NOT pre-transposed)
    bih_ref : (1, H)  RNN input bias
    bhh_ref : (1, H)  RNN hidden bias
    wfc_ref : (O, H)  fc weights W_fc (NOT pre-transposed)
    bfc_ref : (1, O)  fc bias
    out_ref : (B, O)  fc(h_T)
    """
    T = x_ref.shape[0]

    x_tm = x_ref[...]                       # (T, B), f32
    wih = wih_ref[...]                      # (1, H)
    whh = whh_ref[...]                      # (H, H)
    b = bih_ref[...] + bhh_ref[...]         # (1, H), one-time VPU add

    # Hoisted input projection + bias: depends only on inputs, fully off the
    # recurrence's serial dependency chain.  (T, B, 1) * (1, 1, H) + (1, 1, H).
    xb = x_tm[:, :, None] * wih[None, :, :] + b[None, :, :]   # (T, B, H)

    # Step 0: h_0 = 0 -> no recurrent matmul at all.
    h = jnp.tanh(xb[0])                     # (B, H)

    # Statically unrolled recurrence.  Per step the serial chain is
    #   h @ W_hh^T  ->  add xb[t]  ->  tanh
    # with xb[t] a static leading-dim tile load the scheduler hoists freely.
    for t in range(1, T):
        rec = lax.dot_general(h, whh, _DN_RHS_T,
                              preferred_element_type=jnp.float32)   # h @ W_hh^T
        h = jnp.tanh(xb[t] + rec)

    out = lax.dot_general(h, wfc_ref[...], _DN_RHS_T,
                          preferred_element_type=jnp.float32) + bfc_ref[...]
    out_ref[...] = out.astype(out_ref.dtype)


def model_forward(x, params):
    """x: (batch, seq, input_size=1) float32 -> (batch, num_outputs, 1) float32."""
    w_ih, w_hh, b_ih, b_hh, w_fc, b_fc = (
        params["w_ih"], params["w_hh"], params["b_ih"],
        params["b_hh"], params["w_fc"], params["b_fc"],
    )
    B, T, I = x.shape
    assert I == 1, "kernel specialized for input_size == 1 (as in the module)"
    H = w_hh.shape[0]
    O = w_fc.shape[0]

    # Time-major, lane-dense input (T, B).  In the MCMC driver x is the fixed
    # dataset, so this tiny transpose hoists out of the proposal loop entirely.
    x_tm = jnp.transpose(x.reshape(B, T))   # (T, B)
    # Contiguous reshapes only (free); no weight transposes in the wrapper.
    wih = w_ih.reshape(1, H)                # (H, 1) -> (1, H)
    bih = b_ih.reshape(1, H)
    bhh = b_hh.reshape(1, H)
    bfc = b_fc.reshape(1, O)

    flops = 2 * (T - 1) * B * H * H + 2 * T * B * H + 2 * B * H * O
    bytes_accessed = 4 * (T * B + H + H * H + 2 * H + O * H + O + B * O)
    cost = pl.CostEstimate(flops=flops,
                           transcendentals=T * B * H,
                           bytes_accessed=bytes_accessed)

    vmem = pl.BlockSpec(memory_space=pltpu.MemorySpace.VMEM)
    out = pl.pallas_call(
        rnn_fc_kernel,
        out_shape=jax.ShapeDtypeStruct((B, O), jnp.float32),
        in_specs=[vmem] * 7,
        out_specs=vmem,
        cost_estimate=cost,
    )(x_tm, wih, w_hh, bih, bhh, w_fc, bfc)

    return out.reshape(B, O, 1)


def model_forward_ref(x, params):
    """Pure-JAX reference (mirrors PyTorch nn.RNN(batch_first) + nn.Linear)."""
    w_ih, w_hh, b_ih, b_hh, w_fc, b_fc = (
        params["w_ih"], params["w_hh"], params["b_ih"],
        params["b_hh"], params["w_fc"], params["b_fc"],
    )
    B, T, _ = x.shape
    H = w_hh.shape[0]
    h = jnp.zeros((B, H), dtype=jnp.float32)
    for t in range(T):
        h = jnp.tanh(x[:, t, :] @ w_ih.T + b_ih + h @ w_hh.T + b_hh)
    out = h @ w_fc.T + b_fc
    return out.reshape(B, -1, 1)


def init_params(key, input_size, hidden, num_outputs):
    """Deterministic init matching PyTorch parameter shapes (U(-1/sqrt(H), 1/sqrt(H)))."""
    ks = jax.random.split(key, 6)
    bound = 1.0 / jnp.sqrt(jnp.float32(hidden))
    u = lambda k, shape: jax.random.uniform(k, shape, jnp.float32, -bound, bound)
    return {
        "w_ih": u(ks[0], (hidden, input_size)),   # rnn.weight_ih_l0
        "w_hh": u(ks[1], (hidden, hidden)),       # rnn.weight_hh_l0
        "b_ih": u(ks[2], (hidden,)),              # rnn.bias_ih_l0
        "b_hh": u(ks[3], (hidden,)),              # rnn.bias_hh_l0
        "w_fc": u(ks[4], (num_outputs, hidden)),  # fc.weight
        "b_fc": u(ks[5], (num_outputs,)),         # fc.bias
    }


if __name__ == "__main__":
    # topo = [input_seq_len, hidden_size, num_outputs]
    seq_len, hidden, num_outputs = 8, 32, 5
    batch, input_size = 4, 1

    key = jax.random.PRNGKey(0)
    k_x, k_p = jax.random.split(key)
    x = jax.random.normal(k_x, (batch, seq_len, input_size), dtype=jnp.float32)
    params = init_params(k_p, input_size, hidden, num_outputs)

    fwd = jax.jit(model_forward)
    out = jax.block_until_ready(fwd(x, params))
    ref = jax.block_until_ready(model_forward_ref(x, params))

    assert out.shape == (batch, num_outputs, 1), out.shape
    assert jnp.allclose(out, ref, atol=1e-5, rtol=1e-5), \
        f"max err {jnp.max(jnp.abs(out - ref))}"
    print("KERNEL_OK")
</pallas_src>

<mosaic_0001>
module attributes {stable_mosaic.version = 11 : i64} {
  func.func @rnn_fc_kernel(%arg0: memref<8x4xf32, #tpu.memory_space<vmem>>, %arg1: memref<1x32xf32, #tpu.memory_space<vmem>>, %arg2: memref<32x32xf32, #tpu.memory_space<vmem>>, %arg3: memref<1x32xf32, #tpu.memory_space<vmem>>, %arg4: memref<1x32xf32, #tpu.memory_space<vmem>>, %arg5: memref<5x32xf32, #tpu.memory_space<vmem>>, %arg6: memref<1x5xf32, #tpu.memory_space<vmem>>, %arg7: memref<4x5xf32, #tpu.memory_space<vmem>>) attributes {dimension_semantics = [], scalar_prefetch = 0 : i64, scratch_operands = 0 : i64, tpu.core_type = #tpu.core_type<tc>} {
    %c0 = arith.constant 0 : index
    %c0_0 = arith.constant 0 : index
    %0 = vector.load %arg0[%c0, %c0_0] : memref<8x4xf32, #tpu.memory_space<vmem>>, vector<8x4xf32>
    %c0_1 = arith.constant 0 : index
    %c0_2 = arith.constant 0 : index
    %1 = vector.load %arg1[%c0_1, %c0_2] : memref<1x32xf32, #tpu.memory_space<vmem>>, vector<1x32xf32>
    %c0_3 = arith.constant 0 : index
    %c0_4 = arith.constant 0 : index
    %2 = vector.load %arg2[%c0_3, %c0_4] : memref<32x32xf32, #tpu.memory_space<vmem>>, vector<32x32xf32>
    %c0_5 = arith.constant 0 : index
    %c0_6 = arith.constant 0 : index
    %3 = vector.load %arg3[%c0_5, %c0_6] : memref<1x32xf32, #tpu.memory_space<vmem>>, vector<1x32xf32>
    %c0_7 = arith.constant 0 : index
    %c0_8 = arith.constant 0 : index
    %4 = vector.load %arg4[%c0_7, %c0_8] : memref<1x32xf32, #tpu.memory_space<vmem>>, vector<1x32xf32>
    %5 = arith.addf %3, %4 : vector<1x32xf32>
    %6 = vector.shape_cast %0 : vector<8x4xf32> to vector<8x4x1xf32>
    %7 = vector.shape_cast %1 : vector<1x32xf32> to vector<1x1x32xf32>
    %8 = vector.broadcast %6 : vector<8x4x1xf32> to vector<8x4x32xf32>
    %9 = vector.broadcast %7 : vector<1x1x32xf32> to vector<8x4x32xf32>
    %10 = arith.mulf %8, %9 : vector<8x4x32xf32>
    %11 = vector.shape_cast %5 : vector<1x32xf32> to vector<1x1x32xf32>
    %12 = vector.broadcast %11 : vector<1x1x32xf32> to vector<8x4x32xf32>
    %13 = arith.addf %10, %12 : vector<8x4x32xf32>
    %14 = vector.extract_strided_slice %13 {offsets = [0, 0, 0], sizes = [1, 4, 32], strides = [1, 1, 1]} : vector<8x4x32xf32> to vector<1x4x32xf32>
    %15 = vector.shape_cast %14 : vector<1x4x32xf32> to vector<4x32xf32>
    %16 = math.tanh %15 : vector<4x32xf32>
    %cst = arith.constant dense<0.000000e+00> : vector<4x32xf32>
    %17 = tpu.matmul %16, %2, %cst {dimension_numbers = #tpu.dot_dimension_numbers<[1], [1], [0], [0], [0, 0, 1, 0], [], []>} : vector<4x32xf32>, vector<32x32xf32>, vector<4x32xf32> -> vector<4x32xf32>
    %18 = vector.extract_strided_slice %13 {offsets = [1, 0, 0], sizes = [1, 4, 32], strides = [1, 1, 1]} : vector<8x4x32xf32> to vector<1x4x32xf32>
    %19 = vector.shape_cast %18 : vector<1x4x32xf32> to vector<4x32xf32>
    %20 = arith.addf %19, %17 : vector<4x32xf32>
    %21 = math.tanh %20 : vector<4x32xf32>
    %cst_9 = arith.constant dense<0.000000e+00> : vector<4x32xf32>
    %22 = tpu.matmul %21, %2, %cst_9 {dimension_numbers = #tpu.dot_dimension_numbers<[1], [1], [0], [0], [0, 0, 1, 0], [], []>} : vector<4x32xf32>, vector<32x32xf32>, vector<4x32xf32> -> vector<4x32xf32>
    %23 = vector.extract_strided_slice %13 {offsets = [2, 0, 0], sizes = [1, 4, 32], strides = [1, 1, 1]} : vector<8x4x32xf32> to vector<1x4x32xf32>
    %24 = vector.shape_cast %23 : vector<1x4x32xf32> to vector<4x32xf32>
    %25 = arith.addf %24, %22 : vector<4x32xf32>
    %26 = math.tanh %25 : vector<4x32xf32>
    %cst_10 = arith.constant dense<0.000000e+00> : vector<4x32xf32>
    %27 = tpu.matmul %26, %2, %cst_10 {dimension_numbers = #tpu.dot_dimension_numbers<[1], [1], [0], [0], [0, 0, 1, 0], [], []>} : vector<4x32xf32>, vector<32x32xf32>, vector<4x32xf32> -> vector<4x32xf32>
    %28 = vector.extract_strided_slice %13 {offsets = [3, 0, 0], sizes = [1, 4, 32], strides = [1, 1, 1]} : vector<8x4x32xf32> to vector<1x4x32xf32>
    %29 = vector.shape_cast %28 : vector<1x4x32xf32> to vector<4x32xf32>
    %30 = arith.addf %29, %27 : vector<4x32xf32>
    %31 = math.tanh %30 : vector<4x32xf32>
    %cst_11 = arith.constant dense<0.000000e+00> : vector<4x32xf32>
    %32 = tpu.matmul %31, %2, %cst_11 {dimension_numbers = #tpu.dot_dimension_numbers<[1], [1], [0], [0], [0, 0, 1, 0], [], []>} : vector<4x32xf32>, vector<32x32xf32>, vector<4x32xf32> -> vector<4x32xf32>
    %33 = vector.extract_strided_slice %13 {offsets = [4, 0, 0], sizes = [1, 4, 32], strides = [1, 1, 1]} : vector<8x4x32xf32> to vector<1x4x32xf32>
    %34 = vector.shape_cast %33 : vector<1x4x32xf32> to vector<4x32xf32>
    %35 = arith.addf %34, %32 : vector<4x32xf32>
    %36 = math.tanh %35 : vector<4x32xf32>
    %cst_12 = arith.constant dense<0.000000e+00> : vector<4x32xf32>
    %37 = tpu.matmul %36, %2, %cst_12 {dimension_numbers = #tpu.dot_dimension_numbers<[1], [1], [0], [0], [0, 0, 1, 0], [], []>} : vector<4x32xf32>, vector<32x32xf32>, vector<4x32xf32> -> vector<4x32xf32>
    %38 = vector.extract_strided_slice %13 {offsets = [5, 0, 0], sizes = [1, 4, 32], strides = [1, 1, 1]} : vector<8x4x32xf32> to vector<1x4x32xf32>
    %39 = vector.shape_cast %38 : vector<1x4x32xf32> to vector<4x32xf32>
    %40 = arith.addf %39, %37 : vector<4x32xf32>
    %41 = math.tanh %40 : vector<4x32xf32>
    %cst_13 = arith.constant dense<0.000000e+00> : vector<4x32xf32>
    %42 = tpu.matmul %41, %2, %cst_13 {dimension_numbers = #tpu.dot_dimension_numbers<[1], [1], [0], [0], [0, 0, 1, 0], [], []>} : vector<4x32xf32>, vector<32x32xf32>, vector<4x32xf32> -> vector<4x32xf32>
    %43 = vector.extract_strided_slice %13 {offsets = [6, 0, 0], sizes = [1, 4, 32], strides = [1, 1, 1]} : vector<8x4x32xf32> to vector<1x4x32xf32>
    %44 = vector.shape_cast %43 : vector<1x4x32xf32> to vector<4x32xf32>
    %45 = arith.addf %44, %42 : vector<4x32xf32>
    %46 = math.tanh %45 : vector<4x32xf32>
    %cst_14 = arith.constant dense<0.000000e+00> : vector<4x32xf32>
    %47 = tpu.matmul %46, %2, %cst_14 {dimension_numbers = #tpu.dot_dimension_numbers<[1], [1], [0], [0], [0, 0, 1, 0], [], []>} : vector<4x32xf32>, vector<32x32xf32>, vector<4x32xf32> -> vector<4x32xf32>
    %48 = vector.extract_strided_slice %13 {offsets = [7, 0, 0], sizes = [1, 4, 32], strides = [1, 1, 1]} : vector<8x4x32xf32> to vector<1x4x32xf32>
    %49 = vector.shape_cast %48 : vector<1x4x32xf32> to vector<4x32xf32>
    %50 = arith.addf %49, %47 : vector<4x32xf32>
    %51 = math.tanh %50 : vector<4x32xf32>
    %c0_15 = arith.constant 0 : index
    %c0_16 = arith.constant 0 : index
    %52 = vector.load %arg5[%c0_15, %c0_16] : memref<5x32xf32, #tpu.memory_space<vmem>>, vector<5x32xf32>
    %cst_17 = arith.constant dense<0.000000e+00> : vector<4x5xf32>
    %53 = tpu.matmul %51, %52, %cst_17 {dimension_numbers = #tpu.dot_dimension_numbers<[1], [1], [0], [0], [0, 0, 1, 0], [], []>} : vector<4x32xf32>, vector<5x32xf32>, vector<4x5xf32> -> vector<4x5xf32>
    %c0_18 = arith.constant 0 : index
    %c0_19 = arith.constant 0 : index
    %54 = vector.load %arg6[%c0_18, %c0_19] : memref<1x5xf32, #tpu.memory_space<vmem>>, vector<1x5xf32>
    %55 = vector.broadcast %54 : vector<1x5xf32> to vector<4x5xf32>
    %56 = arith.addf %53, %55 : vector<4x5xf32>
    %c0_20 = arith.constant 0 : index
    %c0_21 = arith.constant 0 : index
    %57 = vector.load %arg7[%c0_20, %c0_21] : memref<4x5xf32, #tpu.memory_space<vmem>>, vector<4x5xf32>
    tpu.vector_store %arg7[%c0_20, %c0_21], %56 {strides = array<i32>} : memref<4x5xf32, #tpu.memory_space<vmem>>, vector<4x5xf32>,
    return
  }
}

</mosaic_0001>

<bundles_post_ra>
// kernel: model_forward.1
= control target key start
LH: loop header
LB: loop body
LE: loop exit
PB: predicated region body
PF: predicated region fallthrough
CT: control target
= control target key end

     0   :  { %v36_v0 = vlaneseq  ;;  %v1017_v1 = vmov 0.0|0.0   ;;  %vm121_vm0 = vcmask 261120   ;;  %vm1018_vm2 = vmmov 0   ;;  %s1235_s0 = inlined_call_operand.vmem [shape: f32[8,4], index: 0, kind: input, shape index: {}]   ;;  %s1236_s1 = inlined_call_operand.vmem [shape: f32[1,32], index: 1, kind: input, shape index: {}]   ;;  %s1237_s2 = inlined_call_operand.vmem [shape: f32[32,32], index: 2, kind: input, shape index: {}]   ;;  %s1238_s3 = inlined_call_operand.vmem [shape: f32[1,32], index: 3, kind: input, shape index: {}]   ;;  %s1239_s4 = inlined_call_operand.vmem [shape: f32[1,32], index: 4, kind: input, shape index: {}]   ;;  %s1240_s5 = inlined_call_operand.vmem [shape: f32[5,32], index: 5, kind: input, shape index: {}]   ;;  %s1241_s6 = inlined_call_operand.vmem [shape: f32[1,5], index: 6, kind: input, shape index: {}]   ;;  %s1242_s7 = inlined_call_operand.hbm [shape: f32[4,5], index: 7, kind: output, shape index: {}]  }
   0x1   :  { %917 = vmatprep.subr.bf16.mxu0 %v1017_v1  ;;  %v29_v2 = vld [vmem:[%s1237_s2] sm:$0xff]  ;;  %v30_v3 = vld [vmem:[%s1237_s2 + $0x8] sm:$0xff]  ;;  %925 = vmatprep.subr.bf16.mxu1 %v1017_v1  ;;  %vm1075_vm1 = vmpackc.low %vm121_vm0, %vm121_vm0  ;;  %v1019_v8 = vmov 0.0  }
   0x2   :  { %v1069_v4 = vshrl.u32 %v36_v0, 7  ;;  %v1071_v5 = vpack.c.bf16 %v30_v3, %v29_v2  ;;  %v1082_v7 = vld [vmem:[%s1235_s0] sm:$0xff]  ;;  %843 = vmatprep.mubr.msk.f32.mxu0 %vm1018_vm2, %v1019_v8  ;;  %854 = vmatprep.mubr.msk.f32.mxu1 %vm1018_vm2, %v1019_v8 }
   0x3   :  { %12 = vsyncpa [#allocation3], 0  ;;  %v31_v10 = vld [vmem:[%s1237_s2 + $0x10] sm:$0xff]  ;;  %v32_v11 = vld [vmem:[%s1237_s2 + $0x18] sm:$0xff]  ;;  %s1020_s16 = smov [#allocation2]   ;;  %vm743_vm3 = vcmask 35840  }
   0x4   :  { %v38_v9 = vsub.s32 0, %v1069_v4  ;;  %920 = vmatpush3.bf16.xpose.msk.msra.mxu0 %vm1075_vm1, %v1071_v5  ;;  %928 = vmatpush3.bf16.xpose.msk.msra.mxu1 %vm1075_vm1, %v1071_v5  ;;  %v1104_v13 = vpack.c.bf16 %v32_v11, %v31_v10  ;;  %v45_v14 = vsub.s32 1, %v1069_v4  ;;  %v33_v16 = vld [vmem:[%s1238_s3] sm:$0x1]  ;;  %v52_v25 = vsub.s32 2, %v1069_v4 }
   0x5   :  { %921 = vmatprep.subr.bf16.mxu0 %v1017_v1  ;;  %929 = vmatprep.subr.bf16.mxu1 %v1017_v1  ;;  %v34_v17 = vld [vmem:[%s1239_s4] sm:$0x1]  ;;  %v59_v34 = vsub.s32 3, %v1069_v4  ;;  %v66_v43 = vsub.s32 4, %v1069_v4  ;;  %v73_v52 = vsub.s32 5, %v1069_v4  ;;  %v80_v61 = vsub.s32 6, %v1069_v4 }
   0x6   :  { %v39_v12 = vrot.slane %v1082_v7, %v38_v9  ;;  %v46_v15 = vrot.slane %v1082_v7, %v45_v14  ;;  %v35_v18 = vadd.f32 %v34_v17, %v33_v16  ;;  %v1125_v19 = vld [vmem:[%s1236_s1] ss:$0 sm:$0xff]  ;;  %v53_v26 = vrot.slane %v1082_v7, %v52_v25 }
   0x7   :  { %v60_v35 = vrot.slane %v1082_v7, %v59_v34  ;;  %v67_v44 = vrot.slane %v1082_v7, %v66_v43  ;;  %v74_v53 = vrot.slane %v1082_v7, %v73_v52  ;;  %v81_v62 = vrot.slane %v1082_v7, %v80_v61  ;;  %v795_v25 = vld [vmem:[%s1241_s6] ss:$0 sm:$0xff] }
   0x8   :  { %41 = vbcast.lane.b32.xlu0 %v39_v12, 256  ;;  %v1127_v20 = vrot.slane %v35_v18, %v38_v9  ;;  %55 = vbcast.lane.b32.xlu1 %v53_v26, 256 }
   0xc   :  { %924 = vmatpush3.bf16.xpose.msk.msra.mxu0 %vm1075_vm1, %v1104_v13  ;;  %932 = vmatpush3.bf16.xpose.msk.msra.mxu1 %vm1075_vm1, %v1104_v13 }
   0xd   :  { %933 = vmatprep.subr.bf16.mxu0 %v1017_v1  ;;  %941 = vmatprep.subr.bf16.mxu1 %v1017_v1 }
   0xe   :  { %48 = vbcast.lane.b32.xlu0 %v46_v15, 256  ;;  %62 = vbcast.lane.b32.xlu1 %v60_v35, 256 }
  0x12   :  { %69 = vbcast.lane.b32.xlu0 %v67_v44, 256  ;;  %76 = vbcast.lane.b32.xlu1 %v74_v53, 256 }
  0x16   :  { %83 = vbcast.lane.b32.xlu0 %v81_v62, 256 }
  0x7a   :  { %v42_v21 = vpop.permute.xlu0 %41  ;;  %v56_v36 = vpop.permute.xlu1 %55 }
  0x7b   :  { %v98_v22 = vmul.f32 %v1125_v19, %v42_v21  ;;  %v100_v37 = vmul.f32 %v1125_v19, %v56_v36 }
  0x7d   :  { %v112_v23 = vadd.f32 %v1127_v20, %v98_v22  ;;  %v114_v38 = vadd.f32 %v1127_v20, %v100_v37 }
  0x7f   :  { %977 = vtanh.f32 %v112_v23 }
  0x80   :  { %v49_v27 = vpop.permute.xlu0 %48  ;;  %v63_v45 = vpop.permute.xlu1 %62 }
  0x81   :  { %v99_v28 = vmul.f32 %v1125_v19, %v49_v27  ;;  %v101_v46 = vmul.f32 %v1125_v19, %v63_v45 }
  0x83   :  { %v113_v29 = vadd.f32 %v1127_v20, %v99_v28  ;;  %v115_v47 = vadd.f32 %v1127_v20, %v101_v46 }
  0x84   :  { %v70_v54 = vpop.permute.xlu0 %69  ;;  %v77_v63 = vpop.permute.xlu1 %76 }
  0x85   :  { %v102_v55 = vmul.f32 %v1125_v19, %v70_v54  ;;  %v103_v0 = vmul.f32 %v1125_v19, %v77_v63 }
  0x87   :  { %v116_v56 = vadd.f32 %v1127_v20, %v102_v55  ;;  %v117_v2 = vadd.f32 %v1127_v20, %v103_v0 }
  0x88   :  { %v84_v11 = vpop.permute.xlu0 %83 }
  0x89   :  { %v978_v24 = vpop.eup %977  ;;  %v104_v12 = vmul.f32 %v1125_v19, %v84_v11 }
  0x8a   :  { %844 = vmatmul.mubr.msk.f32.vlgmr.msra.gmra.mrb[0].mxu0 %vm121_vm0, %v978_v24 }
  0x8b   :  { %936 = vmatpush3.bf16.xpose.msk.msra.mxu0 %vm1075_vm1, %v1071_v5  ;;  %865 = vmatprep.mubr.msk.f32.mxu0 %vm1018_vm2, %v1019_v8 }
  0x8c   :  { %937 = vmatprep.subr.bf16.mxu0 %v1017_v1 }
  0x93   :  { %940 = vmatpush3.bf16.xpose.msk.msra.mxu0 %vm1075_vm1, %v1104_v13 }
  0x94   :  { %949 = vmatprep.subr.bf16.mxu0 %v1017_v1 }
 0x15d   :  { %v203_v30 = vpop.f32.mrb[0].mxu0 }
 0x15e   :  { %v207_v31 = vadd.f32 %v203_v30, %v113_v29  ;;  %v845_v32 = vpop.f32.mrb[1].mxu0 }
 0x160   :  { %979 = vtanh.f32 %v207_v31 }
 0x16a   :  { %v980_v33 = vpop.eup %979 }
 0x16b   :  { %855 = vmatmul.mubr.msk.f32.vlgmr.msra.gmra.mrb[0].mxu1 %vm121_vm0, %v980_v33 }
 0x16c   :  { %944 = vmatpush3.bf16.xpose.msk.msra.mxu1 %vm1075_vm1, %v1071_v5  ;;  %876 = vmatprep.mubr.msk.f32.mxu1 %vm1018_vm2, %v1019_v8 }
 0x16d   :  { %945 = vmatprep.subr.bf16.mxu1 %v1017_v1 }
 0x174   :  { %948 = vmatpush3.bf16.xpose.msk.msra.mxu1 %vm1075_vm1, %v1104_v13 }
 0x175   :  { %957 = vmatprep.subr.bf16.mxu1 %v1017_v1 }
 0x23e   :  { %v278_v39 = vpop.f32.mrb[0].mxu1 }
 0x23f   :  { %v282_v40 = vadd.f32 %v278_v39, %v114_v38  ;;  %v856_v41 = vpop.f32.mrb[1].mxu1 }
 0x241   :  { %981 = vtanh.f32 %v282_v40 }
 0x24b   :  { %v982_v42 = vpop.eup %981 }
 0x24c   :  { %866 = vmatmul.mubr.msk.f32.vlgmr.msra.gmra.mrb[2].mxu0 %vm121_vm0, %v982_v42 }
 0x24d   :  { %952 = vmatpush3.bf16.xpose.msk.msra.mxu0 %vm1075_vm1, %v1071_v5  ;;  %887 = vmatprep.mubr.msk.f32.mxu0 %vm1018_vm2, %v1019_v8 }
 0x24e   :  { %953 = vmatprep.subr.bf16.mxu0 %v1017_v1 }
 0x255   :  { %956 = vmatpush3.bf16.xpose.msk.msra.mxu0 %vm1075_vm1, %v1104_v13 }
 0x256   :  { %965 = vmatprep.subr.bf16.mxu0 %v1017_v1 }
 0x31f   :  { %v353_v48 = vpop.f32.mrb[2].mxu0 }
 0x320   :  { %v357_v49 = vadd.f32 %v353_v48, %v115_v47  ;;  %v867_v50 = vpop.f32.mrb[3].mxu0 }
 0x322   :  { %983 = vtanh.f32 %v357_v49 }
 0x32c   :  { %v984_v51 = vpop.eup %983 }
 0x32d   :  { %877 = vmatmul.mubr.msk.f32.vlgmr.msra.gmra.mrb[2].mxu1 %vm121_vm0, %v984_v51 }
 0x32e   :  { %960 = vmatpush3.bf16.xpose.msk.msra.mxu1 %vm1075_vm1, %v1071_v5  ;;  %898 = vmatprep.mubr.msk.f32.mxu1 %vm1018_vm2, %v1019_v8 }
 0x32f   :  { %961 = vmatprep.subr.bf16.mxu1 %v1017_v1 }
 0x336   :  { %964 = vmatpush3.bf16.xpose.msk.msra.mxu1 %vm1075_vm1, %v1104_v13 }
 0x337   :  { %912 = vmatprep.subr.mxu1 %v1019_v8 }
 0x400   :  { %v428_v57 = vpop.f32.mrb[2].mxu1 }
 0x401   :  { %v432_v58 = vadd.f32 %v428_v57, %v116_v56  ;;  %v878_v59 = vpop.f32.mrb[3].mxu1 }
 0x403   :  { %985 = vtanh.f32 %v432_v58 }
 0x40d   :  { %v986_v60 = vpop.eup %985 }
 0x40e   :  { %888 = vmatmul.mubr.msk.f32.vlgmr.msra.gmra.mrb[4].mxu0 %vm121_vm0, %v986_v60 }
 0x40f   :  { %968 = vmatpush3.bf16.xpose.msk.msra.mxu0 %vm1075_vm1, %v1071_v5  ;;  %909 = vmatprep.mubr.msk.f32.mxu0 %vm1018_vm2, %v1019_v8 }
 0x410   :  { %969 = vmatprep.subr.bf16.mxu0 %v1017_v1  ;;  %v87_v1 = vsub.s32 7, %v1069_v4 }
 0x412   :  { %v88_v6 = vrot.slane %v1082_v7, %v87_v1 }
 0x414   :  { %90 = vbcast.lane.b32.xlu1 %v88_v6, 256 }
 0x417   :  { %972 = vmatpush3.bf16.xpose.msk.msra.mxu0 %vm1075_vm1, %v1104_v13  ;;  %v118_v13 = vadd.f32 %v1127_v20, %v104_v12 }
 0x486   :  { %v91_v4 = vpop.permute.xlu1 %90 }
 0x487   :  { %v105_v7 = vmul.f32 %v1125_v19, %v91_v4 }
 0x489   :  { %v119_v18 = vadd.f32 %v1127_v20, %v105_v7 }
 0x4e1   :  { %v503_v3 = vpop.f32.mrb[4].mxu0 }
 0x4e2   :  { %v507_v5 = vadd.f32 %v503_v3, %v117_v2  ;;  %v889_v9 = vpop.f32.mrb[5].mxu0 }
 0x4e4   :  { %987 = vtanh.f32 %v507_v5 }
 0x4ee   :  { %v988_v10 = vpop.eup %987 }
 0x4ef   :  { %899 = vmatmul.mubr.msk.f32.vlgmr.msra.gmra.mrb[4].mxu1 %vm121_vm0, %v988_v10 }
 0x4f0   :  { %914 = vmatprep.mubr.msk.f32.mxu1 %vm1018_vm2, %v1019_v8  ;;  %v659_v8 = vld [vmem:[%s1240_s5] sm:$0x1f]  ;;  %s751_s5 = sshll.u32 %s1020_s16, 4  ;;  %s752_s5 = int_to_ptr.vmem [resolvable:$true] %s751_s5 }
 0x4f1   :  { %913 = vmatpush3.xpose.msk.msra.mxu1 %vm121_vm0, %v659_v8  ;;  %s993_s17 = scalar_lea.vmem %s752_s5, 64  ;;  %p998_p1 = scmp.lt.s32.totalorder %s752_s5, %s752_s5 }
 0x4f2   :  { %p994_p0 = scmp.ne.s32.totalorder %s752_s5, %s993_s17  ;;  %p999_p2 = scmp.lt.s32.totalorder %s993_s17, %s993_s17 }
 0x4f4   :  { %p1000_p3 = por %p999_p2, %p998_p1 }
 0x4f6   :  { %p1001_p4 = pnand %p1000_p3, %p994_p0 }
 0x5c2   :  { %v578_v14 = vpop.f32.mrb[4].mxu1 }
 0x5c3   :  { %v582_v15 = vadd.f32 %v578_v14, %v118_v13  ;;  %v900_v16 = vpop.f32.mrb[5].mxu1 }
 0x5c5   :  { %989 = vtanh.f32 %v582_v15 }
 0x5cf   :  { %v990_v17 = vpop.eup %989 }
 0x5d0   :  { %910 = vmatmul.mubr.msk.f32.vlgmr.msra.gmra.mrb[6].mxu0 %vm121_vm0, %v990_v17 }
 0x6a3   :  { %v653_v21 = vpop.f32.mrb[6].mxu0 }
 0x6a4   :  { %v657_v22 = vadd.f32 %v653_v21, %v119_v18  ;;  %v911_v23 = vpop.f32.mrb[7].mxu0 }
 0x6a6   :  { %991 = vtanh.f32 %v657_v22 }
 0x6b0   :  { %v992_v24 = vpop.eup %991 }
 0x6b1   :  { %915 = vmatmul.mubr.msk.f32.vlgmr.msra.gmra.mrb[6].mxu1 %vm121_vm0, %v992_v24 }
 0x784   :  { %v739_v26 = vpop.f32.mrb[6].mxu1 }
 0x785   :  { %v740_v27 = vadd.f32 %v795_v25, %v739_v26  ;;  %v916_v28 = vpop.f32.mrb[7].mxu1 }
 0x787   :  { %744 = vst.msk [vmem:[#allocation2] sm:$0xf] %vm743_vm3, %v740_v27 }
 0x788   :  { %1004 = shalt.err (!%p1001_p4)
}
 0x789   :  { %s1005_s20 = scalar_lea.hbm %s1242_s7, 64 }
 0x78a   :  { %p1006_p5 = scmp.ne.s32.totalorder %s1242_s7, %s1005_s20  ;;  %p1009_p6 = scmp.lt.u32.totalorder %s1005_s20, %s1242_s7 }
 0x78c   :  { %p1011_p7 = pnand %p1009_p6, %p1006_p5 }
 0x78e   :  { %1014 = shalt.err (!%p1011_p7)
}
 0x78f   :  { %754 = dma.vmem_to_hbm [thread:$0]  %s752_s5, 64, %s1242_s7, [#allocation3]  }
 0x790   :  { %1015 = dma.done.wait [#allocation3], 64  }
 0x791   :  { %1016 = vsyncadd [#allocation3], 4294967232 }
 0x792   :  { %758 = vsyncpa [#allocation3], 1 }

</bundles_post_ra>
